<compile_context>
chip_gen: v5e
topology: v5e:2x2
jax: 0.10.0
libtpu: 0.0.40
codegen_flags: <defaults>
</compile_context>

<pallas_src>
import jax
import jax.numpy as jnp
from jax.experimental import pallas as pl
from jax.experimental.pallas import tpu as pltpu


def _align8(n):
    return ((n + 7) // 8) * 8


def _slab_layout(cin, cf, hd2):
    """Row offsets (8-aligned) of each parameter block inside the slab."""
    r_cw = 0                          # (cf, cin+1): conv weight^T cols + bias col
    r_wf = _align8(r_cw + cf)         # (cf, 2*hd): fused feature-extractor weight
    r_bf = _align8(r_wf + cf)         # (1, 2*hd):  fused feature-extractor bias
    r_wh = _align8(r_bf + 1)          # (2*hd, 128): block-diagonal fused heads
    r_bh = _align8(r_wh + hd2)        # (1, 128):   fused head bias
    p_rows = _align8(r_bh + 1)
    return r_cw, r_wf, r_bf, r_wh, r_bh, p_rows


def pack_params(p, out_w=128):
    """Pack all weights/biases into one (p_rows, 128) f32 VMEM slab."""
    cin, cf = p["cw"].shape
    hd = p["wbf"].shape[1]
    hd2 = 2 * hd
    nb = p["wbh"].shape[1]
    ne = p["weh"].shape[1]
    assert max(cin + 1, cf, hd2, nb + ne) <= out_w, "toy sizes must fit 128 lanes"

    rows = _slab_layout(cin, cf, hd2)
    r_cw, r_wf, r_bf, r_wh, r_bh, p_rows = rows

    slab = jnp.zeros((p_rows, out_w), jnp.float32)
    # conv block stored column-wise: per-channel weight columns + bias column
    # (so the kernel reads (cf, 1) columns that lane-broadcast with no relayout)
    slab = slab.at[r_cw:r_cw + cf, 0:cin].set(p["cw"].T)
    slab = slab.at[r_cw:r_cw + cf, cin].set(p["cb"][0])
    # fused per-task feature extractors
    slab = slab.at[r_wf:r_wf + cf, 0:hd2].set(
        jnp.concatenate([p["wbf"], p["wef"]], axis=1))
    slab = slab.at[r_bf, 0:hd2].set(
        jnp.concatenate([p["bbf"][0], p["bef"][0]]))
    # block-diagonal fused heads (breed -> lanes [0,nb), emotion -> [nb,nb+ne))
    slab = slab.at[r_wh:r_wh + hd, 0:nb].set(p["wbh"])
    slab = slab.at[r_wh + hd:r_wh + hd2, nb:nb + ne].set(p["weh"])
    slab = slab.at[r_bh, 0:nb].set(p["bbh"][0])
    slab = slab.at[r_bh, nb:nb + ne].set(p["beh"][0])
    return slab, rows


def _make_kernel(cin, cf, hd2, rows, s):
    r_cw, r_wf, r_bf, r_wh, r_bh, _ = rows

    def kernel(x_ref, p_ref, out_ref):
        # x_ref: (tn, cin, S) lane-dense;  p_ref: (p_rows, 128);  out_ref: (tn, 128)

        def col(j):  # (1, cf, 1) column from the conv block
            return p_ref[r_cw:r_cw + cf, j:j + 1][None]

        # --- backbone stand-in: 1x1 conv as `cin` VPU broadcast-FMAs ----------
        # (contraction depth is only cin -> MXU stays free for the head matmuls)
        acc = x_ref[:, 0:1, :] * col(0) + col(cin)            # + conv bias
        for c in range(1, cin):                                # static unroll
            acc = acc + x_ref[:, c:c + 1, :] * col(c)          # (tn, cf, S)
        conv = jnp.clip(acc, 0.0, 6.0)                         # ReLU6
        feats = jnp.mean(conv, axis=-1)                        # GAP -> (tn, cf)

        # --- fused per-task feature extractors: one (cf, 2*hd) matmul ---------
        wf = p_ref[r_wf:r_wf + cf, 0:hd2]
        bf = p_ref[r_bf:r_bf + 1, 0:hd2]
        h = jnp.dot(feats, wf, preferred_element_type=jnp.float32) + bf
        h = jnp.where(h >= 0.0, h, 0.01 * h)   # LeakyReLU(0.01); Dropout=id (eval)

        # --- fused heads: block-diagonal (2*hd, 128) matmul -> lane-dense slab -
        wh = p_ref[r_wh:r_wh + hd2, :]
        bh = p_ref[r_bh:r_bh + 1, :]
        out_ref[...] = (jnp.dot(h, wh, preferred_element_type=jnp.float32)
                        + bh).astype(out_ref.dtype)

    return kernel


def cat_multitask_forward(x_nchw, params):
    """Fused forward.  Returns (breed_logits, emotion_logits)."""
    N, Cin, H, W = x_nchw.shape
    S = H * W
    # NCHW -> (N, Cin, H*W): free reshape (no transpose); S on the lane axis.
    x = x_nchw.reshape(N, Cin, S).astype(jnp.float32)

    cf = params["cw"].shape[1]
    hd2 = 2 * params["wbf"].shape[1]
    nb = params["wbh"].shape[1]
    ne = params["weh"].shape[1]
    out_w = 128                                   # lane-dense padded output slab

    slab, rows = pack_params(params, out_w)
    p_rows = rows[-1]

    # Batch grid ("parallel" -> both TCs on v7x); params resident via index 0.
    tile_n = N if N <= 8 else 8
    n_pad = ((N + tile_n - 1) // tile_n) * tile_n
    if n_pad != N:
        x = jnp.pad(x, ((0, n_pad - N), (0, 0), (0, 0)))

    kernel = _make_kernel(Cin, cf, hd2, rows, S)
    out = pl.pallas_call(
        kernel,
        out_shape=jax.ShapeDtypeStruct((n_pad, out_w), jnp.float32),
        grid_spec=pltpu.PrefetchScalarGridSpec(
            num_scalar_prefetch=0,
            grid=(n_pad // tile_n,),
            in_specs=[
                pl.BlockSpec((tile_n, Cin, S), lambda i: (i, 0, 0)),
                pl.BlockSpec((p_rows, out_w), lambda i: (0, 0)),
            ],
            out_specs=pl.BlockSpec((tile_n, out_w), lambda i: (i, 0)),
        ),
        compiler_params=pltpu.CompilerParams(
            dimension_semantics=("parallel",)),
    )(x, slab)

    return out[:N, 0:nb], out[:N, nb:nb + ne]


def forward_task(x_nchw, params, task="breed"):
    breed, emotion = cat_multitask_forward(x_nchw, params)
    return breed if task == "breed" else emotion


# ---------------------------------------------------------------------------
# Deterministic parameter construction (stand-in backbone + exact MT heads)
# ---------------------------------------------------------------------------
def make_params(key, cin=3, feature_dim=32, num_breed=8, num_emotion=4):
    hidden = feature_dim // 2
    ks = jax.random.split(key, 10)

    def lin(k, fan_in, fan_out):
        bound = 1.0 / jnp.sqrt(fan_in)
        return jax.random.uniform(k, (fan_in, fan_out), jnp.float32, -bound, bound)

    return {
        "cw": lin(ks[0], cin, feature_dim),
        "cb": jax.random.uniform(ks[1], (1, feature_dim), jnp.float32, -0.1, 0.1),
        "wbf": lin(ks[2], feature_dim, hidden),
        "bbf": jax.random.uniform(ks[3], (1, hidden), jnp.float32, -0.1, 0.1),
        "wbh": lin(ks[4], hidden, num_breed),
        "bbh": jax.random.uniform(ks[5], (1, num_breed), jnp.float32, -0.1, 0.1),
        "wef": lin(ks[6], feature_dim, hidden),
        "bef": jax.random.uniform(ks[7], (1, hidden), jnp.float32, -0.1, 0.1),
        "weh": lin(ks[8], hidden, num_emotion),
        "beh": jax.random.uniform(ks[9], (1, num_emotion), jnp.float32, -0.1, 0.1),
    }


# ---------------------------------------------------------------------------
# Pure-JAX reference (same math) for correctness
# ---------------------------------------------------------------------------
def reference_forward(x_nchw, p):
    N, Cin, H, W = x_nchw.shape
    x = x_nchw.reshape(N, Cin, H * W).astype(jnp.float32)
    conv = jnp.einsum("ncs,cf->nfs", x, p["cw"]) + p["cb"][0][None, :, None]
    conv = jnp.clip(conv, 0.0, 6.0)
    feats = jnp.mean(conv, axis=-1)
    leaky = lambda v: jnp.where(v >= 0.0, v, 0.01 * v)
    hb = leaky(feats @ p["wbf"] + p["bbf"])
    he = leaky(feats @ p["wef"] + p["bef"])
    return hb @ p["wbh"] + p["bbh"], he @ p["weh"] + p["beh"]


if __name__ == "__main__":
    key = jax.random.PRNGKey(0)
    k_x, k_p = jax.random.split(key)

    N, Cin, H, W = 2, 3, 16, 16
    x = jax.random.normal(k_x, (N, Cin, H, W), jnp.float32)
    params = make_params(k_p, cin=Cin, feature_dim=32, num_breed=8, num_emotion=4)

    fwd = jax.jit(lambda xx: cat_multitask_forward(xx, params))
    breed, emotion = jax.block_until_ready(fwd(x))

    ref_breed, ref_emotion = reference_forward(x, params)
    assert breed.shape == (N, 8) and emotion.shape == (N, 4)
    assert jnp.allclose(breed, ref_breed, atol=1e-4, rtol=1e-4)
    assert jnp.allclose(emotion, ref_emotion, atol=1e-4, rtol=1e-4)

    # task-selection path (matches forward(x, task=...))
    b_only = jax.block_until_ready(forward_task(x, params, task="breed"))
    assert jnp.allclose(b_only, ref_breed, atol=1e-4, rtol=1e-4)

    print("KERNEL_OK")
</pallas_src>

<mosaic_0001>
module attributes {stable_mosaic.version = 11 : i64} {
  func.func @kernel(%arg0: i32, %arg1: memref<2x3x256xf32, #tpu.memory_space<vmem>>, %arg2: memref<112x128xf32, #tpu.memory_space<vmem>>, %arg3: memref<2x128xf32, #tpu.memory_space<vmem>>) attributes {dimension_semantics = [#tpu.dimension_semantics<parallel>], iteration_bounds = array<i64: 1>, scalar_prefetch = 0 : i64, scratch_operands = 0 : i64, tpu.core_type = #tpu.core_type<tc>, window_params = [{transform_indices = @transform_0, window_bounds = array<i64: 2, 3, 256>}, {pipeline_mode = #tpu.pipeline_mode<synchronous>, transform_indices = @transform_1, window_bounds = array<i64: 112, 128>}, {transform_indices = @transform_2, window_bounds = array<i64: 2, 128>}]} {
    %c0 = arith.constant 0 : index
    %c0_0 = arith.constant 0 : index
    %c0_1 = arith.constant 0 : index
    %0 = vector.load %arg1[%c0, %c0_0, %c0_1] : memref<2x3x256xf32, #tpu.memory_space<vmem>>, vector<2x1x256xf32>
    %c0_2 = arith.constant 0 : index
    %c0_3 = arith.constant 0 : index
    %1 = vector.load %arg2[%c0_2, %c0_3] : memref<112x128xf32, #tpu.memory_space<vmem>>, vector<32x1xf32>
    %2 = vector.shape_cast %1 : vector<32x1xf32> to vector<1x32x1xf32>
    %3 = vector.broadcast %0 : vector<2x1x256xf32> to vector<2x32x256xf32>
    %4 = vector.broadcast %2 : vector<1x32x1xf32> to vector<2x32x256xf32>
    %5 = arith.mulf %3, %4 : vector<2x32x256xf32>
    %c0_4 = arith.constant 0 : index
    %c3 = arith.constant 3 : index
    %6 = vector.load %arg2[%c0_4, %c3] : memref<112x128xf32, #tpu.memory_space<vmem>>, vector<32x1xf32>
    %7 = vector.shape_cast %6 : vector<32x1xf32> to vector<1x32x1xf32>
    %8 = vector.broadcast %7 : vector<1x32x1xf32> to vector<2x32x256xf32>
    %9 = arith.addf %5, %8 : vector<2x32x256xf32>
    %c0_5 = arith.constant 0 : index
    %c1 = arith.constant 1 : index
    %c0_6 = arith.constant 0 : index
    %10 = vector.load %arg1[%c0_5, %c1, %c0_6] : memref<2x3x256xf32, #tpu.memory_space<vmem>>, vector<2x1x256xf32>
    %c0_7 = arith.constant 0 : index
    %c1_8 = arith.constant 1 : index
    %11 = vector.load %arg2[%c0_7, %c1_8] : memref<112x128xf32, #tpu.memory_space<vmem>>, vector<32x1xf32>
    %12 = vector.shape_cast %11 : vector<32x1xf32> to vector<1x32x1xf32>
    %13 = vector.broadcast %10 : vector<2x1x256xf32> to vector<2x32x256xf32>
    %14 = vector.broadcast %12 : vector<1x32x1xf32> to vector<2x32x256xf32>
    %15 = arith.mulf %13, %14 : vector<2x32x256xf32>
    %16 = arith.addf %9, %15 : vector<2x32x256xf32>
    %c0_9 = arith.constant 0 : index
    %c2 = arith.constant 2 : index
    %c0_10 = arith.constant 0 : index
    %17 = vector.load %arg1[%c0_9, %c2, %c0_10] : memref<2x3x256xf32, #tpu.memory_space<vmem>>, vector<2x1x256xf32>
    %c0_11 = arith.constant 0 : index
    %c2_12 = arith.constant 2 : index
    %18 = vector.load %arg2[%c0_11, %c2_12] : memref<112x128xf32, #tpu.memory_space<vmem>>, vector<32x1xf32>
    %19 = vector.shape_cast %18 : vector<32x1xf32> to vector<1x32x1xf32>
    %20 = vector.broadcast %17 : vector<2x1x256xf32> to vector<2x32x256xf32>
    %21 = vector.broadcast %19 : vector<1x32x1xf32> to vector<2x32x256xf32>
    %22 = arith.mulf %20, %21 : vector<2x32x256xf32>
    %23 = arith.addf %16, %22 : vector<2x32x256xf32>
    %cst = arith.constant 0.000000e+00 : f32
    %cst_13 = arith.constant 6.000000e+00 : f32
    %24 = vector.broadcast %cst : f32 to vector<2x32x256xf32>
    %25 = arith.maximumf %24, %23 : vector<2x32x256xf32>
    %26 = vector.broadcast %cst_13 : f32 to vector<2x32x256xf32>
    %27 = arith.minimumf %26, %25 : vector<2x32x256xf32>
    %cst_14 = arith.constant dense<0.000000e+00> : vector<2x32xf32>
    %28 = vector.multi_reduction <add>, %27, %cst_14 [2] : vector<2x32x256xf32> to vector<2x32xf32>
    %cst_15 = arith.constant 2.560000e+02 : f32
    %29 = vector.broadcast %cst_15 : f32 to vector<2x32xf32>
    %30 = arith.divf %28, %29 : vector<2x32xf32>
    %c32 = arith.constant 32 : index
    %c0_16 = arith.constant 0 : index
    %31 = vector.load %arg2[%c32, %c0_16] : memref<112x128xf32, #tpu.memory_space<vmem>>, vector<32x32xf32>
    %c64 = arith.constant 64 : index
    %c0_17 = arith.constant 0 : index
    %32 = vector.load %arg2[%c64, %c0_17] : memref<112x128xf32, #tpu.memory_space<vmem>>, vector<1x32xf32>
    %cst_18 = arith.constant dense<0.000000e+00> : vector<2x32xf32>
    %33 = tpu.matmul %30, %31, %cst_18 {dimension_numbers = #tpu.dot_dimension_numbers<[1], [0], [0], [1], [0, 0, 1, 1], [], []>} : vector<2x32xf32>, vector<32x32xf32>, vector<2x32xf32> -> vector<2x32xf32>
    %34 = vector.broadcast %32 : vector<1x32xf32> to vector<2x32xf32>
    %35 = arith.addf %33, %34 : vector<2x32xf32>
    %cst_19 = arith.constant 0.000000e+00 : f32
    %36 = vector.broadcast %cst_19 : f32 to vector<2x32xf32>
    %37 = arith.cmpf oge, %35, %36 : vector<2x32xf32>
    %cst_20 = arith.constant 0.00999999977 : f32
    %38 = vector.broadcast %cst_20 : f32 to vector<2x32xf32>
    %39 = arith.mulf %38, %35 : vector<2x32xf32>
    %40 = arith.select %37, %35, %39 : vector<2x32xi1>, vector<2x32xf32>
    %c72 = arith.constant 72 : index
    %c0_21 = arith.constant 0 : index
    %41 = vector.load %arg2[%c72, %c0_21] : memref<112x128xf32, #tpu.memory_space<vmem>>, vector<32x128xf32>
    %c104 = arith.constant 104 : index
    %c0_22 = arith.constant 0 : index
    %42 = vector.load %arg2[%c104, %c0_22] : memref<112x128xf32, #tpu.memory_space<vmem>>, vector<1x128xf32>
    %cst_23 = arith.constant dense<0.000000e+00> : vector<2x128xf32>
    %43 = tpu.matmul %40, %41, %cst_23 {dimension_numbers = #tpu.dot_dimension_numbers<[1], [0], [0], [1], [0, 0, 1, 1], [], []>} : vector<2x32xf32>, vector<32x128xf32>, vector<2x128xf32> -> vector<2x128xf32>
    %44 = vector.broadcast %42 : vector<1x128xf32> to vector<2x128xf32>
    %45 = arith.addf %43, %44 : vector<2x128xf32>
    %c0_24 = arith.constant 0 : index
    %c0_25 = arith.constant 0 : index
    %46 = vector.load %arg3[%c0_24, %c0_25] : memref<2x128xf32, #tpu.memory_space<vmem>>, vector<2x128xf32>
    tpu.vector_store %arg3[%c0_24, %c0_25], %45 {strides = array<i32>} : memref<2x128xf32, #tpu.memory_space<vmem>>, vector<2x128xf32>,
    return
  }
  func.func @transform_0(%arg0: i32) -> (i32, i32, i32) {
    %c0_i32 = arith.constant 0 : i32
    %c0_i32_0 = arith.constant 0 : i32
    %c0_i32_1 = arith.constant 0 : i32
    return %arg0, %c0_i32, %c0_i32_0 : i32, i32, i32
  }
  func.func @transform_1(%arg0: i32) -> (i32, i32) {
    %c0_i32 = arith.constant 0 : i32
    %c0_i32_0 = arith.constant 0 : i32
    %c0_i32_1 = arith.constant 0 : i32
    return %c0_i32, %c0_i32_0 : i32, i32
  }
  func.func @transform_2(%arg0: i32) -> (i32, i32) {
    %c0_i32 = arith.constant 0 : i32
    %c0_i32_0 = arith.constant 0 : i32
    return %arg0, %c0_i32 : i32, i32
  }
}

</mosaic_0001>

<bundles_post_ra>
// kernel: _lambda_.1
= control target key start
LH: loop header
LB: loop body
LE: loop exit
PB: predicated region body
PF: predicated region fallthrough
CT: control target
= control target key end

     0   :  { %v413_v0 = vmov 0   ;;  %v414_v3 = vmov 3   ;;  %v415_v6 = vmov 1   ;;  %v416_v7 = vmov 2   ;;  %s606_s1 = inlined_call_operand.vmem [shape: f32[112,128], index: 1, kind: input, shape index: {}]   ;;  %s607_s0 = inlined_call_operand.vmem [shape: f32[2,3,256], index: 0, kind: input, shape index: {}]   ;;  %s608_s2 = inlined_call_operand.vmem [shape: f32[2,128], index: 2, kind: output, shape index: {}]  }
   0x1   :  { %402 = vset.pattern.permute.xlu1 %v413_v0  ;;  %401 = vset.pattern.permute.xlu0 %v413_v0  ;;  %v16_v1 = vld [vmem:[%s606_s1 + $0x10] sm:$0xff]  ;;  %v14_v2 = vld [vmem:[%s606_s1] sm:$0xff]  ;;  %v17_v4 = vld [vmem:[%s606_s1 + $0x18] sm:$0xff]  ;;  %vm310_vm1 = vcmask 130112   ;;  %vm314_vm2 = vcmask 195712   ;;  %vm318_vm3 = vcmask 261312  }
   0x2   :  { %40 = vperm.xlu1 %402, %v16_v1   ;;  %30 = vperm.xlu0 %401, %v14_v2   ;;  %v15_v5 = vld [vmem:[%s606_s1 + $0x8] sm:$0xff]  ;;  %v11_v13 = vld [vmem:[%s607_s0] ss:$4 sm:$0x3]  ;;  %vm327_vm4 = vcmask 1041409   ;;  %vm329_vm5 = vcmask 261120  }
   0x3   :  { %403 = vset.pattern.permute.xlu2 %v414_v3  ;;  %v456_v17 = vperm.slane %v11_v13, 0  ;;  %v458_v18 = vperm.slane %v11_v13, 1  ;;  %v390_v19 = vld [vmem:[%s607_s0 + $0x1] ss:$4 sm:$0x3] }
   0x4   :  { %65 = vperm.xlu2 %403, %v14_v2   ;;  %v392_v20 = vld [vmem:[%s607_s0 + $0x2] ss:$4 sm:$0x3]  ;;  %v468_v23 = vperm.slane %v390_v19, 0  ;;  %v470_v24 = vperm.slane %v390_v19, 1 }
   0x5   :  { %v472_v25 = vperm.slane %v392_v20, 0  ;;  %v474_v26 = vperm.slane %v392_v20, 1  ;;  %v389_v28 = vld [vmem:[%s607_s0 + $0x8] ss:$4 sm:$0x3] }
   0x6   :  { %v391_v33 = vld [vmem:[%s607_s0 + $0x9] ss:$4 sm:$0x3]  ;;  %v22_v38 = vperm.slane %v389_v28, 0  ;;  %v23_v39 = vperm.slane %v389_v28, 1 }
   0x7   :  { %v492_v42 = vperm.slane %v391_v33, 0  ;;  %v393_v43 = vld [vmem:[%s607_s0 + $0xa] ss:$4 sm:$0x3]  ;;  %v499_v50 = vperm.slane %v391_v33, 1 }
   0x8   :  { %v501_v52 = vperm.slane %v393_v43, 0  ;;  %v505_v58 = vperm.slane %v393_v43, 1 }
   0xa   :  { %45 = vperm.xlu1 %402, %v17_v4   ;;  %35 = vperm.xlu0 %401, %v15_v5  }
   0xc   :  { %69 = vperm.xlu2 %403, %v15_v5  }
  0x12   :  { %405 = vset.pattern.permute.xlu1 %v415_v6  ;;  %404 = vset.pattern.permute.xlu0 %v415_v6 }
  0x13   :  { %115 = vperm.xlu1 %405, %v15_v5   ;;  %111 = vperm.xlu0 %404, %v14_v2  }
  0x14   :  { %73 = vperm.xlu2 %403, %v16_v1  }
  0x1b   :  { %119 = vperm.xlu1 %405, %v16_v1   ;;  %123 = vperm.xlu0 %404, %v17_v4  }
  0x1c   :  { %77 = vperm.xlu2 %403, %v17_v4  }
  0x23   :  { %406 = vset.pattern.permute.xlu1 %v416_v7  ;;  %408 = vset.pattern.permute.xlu0 %v416_v7 }
  0x24   :  { %173 = vperm.xlu1 %406, %v14_v2   ;;  %181 = vperm.xlu0 %408, %v16_v1  }
  0x25   :  { %407 = vset.pattern.permute.xlu2 %v416_v7 }
  0x26   :  { %177 = vperm.xlu2 %407, %v15_v5  }
  0x2c   :  { %185 = vperm.xlu1 %406, %v17_v4  }
  0x5e   :  { %v445_v8 = vpop.permute.xlu2 %65 }
  0x66   :  { %v447_v9 = vpop.permute.xlu2 %69 }
  0x6e   :  { %v74_v10 = vpop.permute.xlu2 %73 }
  0x74   :  { %v41_v11 = vpop.permute.xlu1 %40  ;;  %v31_v12 = vpop.permute.xlu0 %30 }
  0x75   :  { %v52_v44 = vmul.f32 %v41_v11, %v456_v17  ;;  %v53_v45 = vmul.f32 %v41_v11, %v458_v18  ;;  %v60_v48 = vmul.f32 %v41_v11, %v22_v38  ;;  %v61_v49 = vmul.f32 %v41_v11, %v23_v39 }
  0x76   :  { %v452_v14 = vpop.permute.xlu2 %77  ;;  %v48_v55 = vmul.f32 %v31_v12, %v456_v17  ;;  %v49_v56 = vmul.f32 %v31_v12, %v458_v18  ;;  %v56_v57 = vmul.f32 %v31_v12, %v22_v38  ;;  %v57_v61 = vmul.f32 %v31_v12, %v23_v39 }
  0x77   :  { %v511_v62 = vadd.f32 %v74_v10, %v52_v44  ;;  %v513_v63 = vadd.f32 %v74_v10, %v53_v45  ;;  %v92_v1 = vadd.f32 %v74_v10, %v60_v48  ;;  %v93_v2 = vadd.f32 %v74_v10, %v61_v49 }
  0x78   :  { %v80_v28 = vadd.f32 %v445_v8, %v48_v55  ;;  %v89_v33 = vadd.f32 %v445_v8, %v57_v61 }
  0x7c   :  { %v454_v15 = vpop.permute.xlu1 %45  ;;  %v36_v16 = vpop.permute.xlu0 %35 }
  0x7d   :  { %v50_v21 = vmul.f32 %v36_v16, %v456_v17  ;;  %v51_v22 = vmul.f32 %v36_v16, %v458_v18  ;;  %v58_v51 = vmul.f32 %v36_v16, %v22_v38  ;;  %v62_v3 = vmul.f32 %v454_v15, %v22_v38 }
  0x7e   :  { %v59_v4 = vmul.f32 %v36_v16, %v23_v39  ;;  %v63_v5 = vmul.f32 %v454_v15, %v23_v39 }
  0x7f   :  { %v82_v29 = vadd.f32 %v447_v9, %v50_v21  ;;  %v83_v30 = vadd.f32 %v447_v9, %v51_v22  ;;  %v90_v6 = vadd.f32 %v447_v9, %v58_v51 }
  0x80   :  { %v476_v27 = vpop.permute.xlu2 %177 }
  0x81   :  { %v190_v36 = vmul.f32 %v476_v27, %v472_v25  ;;  %v191_v37 = vmul.f32 %v476_v27, %v474_v26  ;;  %v198_v20 = vmul.f32 %v476_v27, %v501_v52 }
  0x85   :  { %v116_v31 = vpop.permute.xlu1 %115  ;;  %v112_v32 = vpop.permute.xlu0 %111 }
  0x86   :  { %v128_v34 = vmul.f32 %v116_v31, %v468_v23  ;;  %v129_v35 = vmul.f32 %v116_v31, %v470_v24  ;;  %v136_v0 = vmul.f32 %v116_v31, %v492_v42  ;;  %v137_v13 = vmul.f32 %v116_v31, %v499_v50 }
  0x87   :  { %v126_v12 = vmul.f32 %v112_v32, %v468_v23  ;;  %v134_v19 = vmul.f32 %v112_v32, %v492_v42  ;;  %v127_v10 = vmul.f32 %v112_v32, %v470_v24  ;;  %v135_v21 = vmul.f32 %v112_v32, %v499_v50 }
  0x88   :  { %v144_v40 = vadd.f32 %v128_v34, %v82_v29  ;;  %v145_v41 = vadd.f32 %v129_v35, %v83_v30  ;;  %v152_v22 = vadd.f32 %v136_v0, %v90_v6  ;;  %v81_v29 = vadd.f32 %v445_v8, %v49_v56 }
  0x89   :  { %v88_v30 = vadd.f32 %v445_v8, %v56_v57  ;;  %v91_v31 = vadd.f32 %v447_v9, %v59_v4  ;;  %v94_v34 = vadd.f32 %v452_v14, %v62_v3  ;;  %v142_v8 = vadd.f32 %v126_v12, %v80_v28 }
  0x8a   :  { %v206_v46 = vadd.f32 %v190_v36, %v144_v40  ;;  %v207_v47 = vadd.f32 %v191_v37, %v145_v41  ;;  %v95_v36 = vadd.f32 %v452_v14, %v63_v5  ;;  %v199_v37 = vmul.f32 %v476_v27, %v505_v58 }
  0x8b   :  { %v150_v38 = vadd.f32 %v134_v19, %v88_v30  ;;  %v153_v39 = vadd.f32 %v137_v13, %v91_v31  ;;  %v151_v41 = vadd.f32 %v135_v21, %v89_v33  ;;  %v143_v43 = vadd.f32 %v127_v10, %v81_v29 }
  0x8c   :  { %v222_v53 = vmax.f32 %v206_v46, 0.0  ;;  %v223_v54 = vmax.f32 %v207_v47, 0.0  ;;  %v214_v44 = vadd.f32 %v198_v20, %v152_v22 }
  0x8d   :  { %v507_v59 = vpop.permute.xlu1 %119  ;;  %v509_v60 = vpop.permute.xlu0 %123 }
  0x8e   :  { %v238_v7 = vmin.f32 %v222_v53, 6.0  ;;  %v239_v11 = vmin.f32 %v223_v54, 6.0  ;;  %v138_v35 = vmul.f32 %v507_v59, %v492_v42  ;;  %v139_v32 = vmul.f32 %v507_v59, %v499_v50 }
  0x8f   :  { %v140_v61 = vmul.f32 %v509_v60, %v492_v42  ;;  %v141_v0 = vmul.f32 %v509_v60, %v499_v50  ;;  %v130_v42 = vmul.f32 %v507_v59, %v468_v23  ;;  %v131_v50 = vmul.f32 %v507_v59, %v470_v24 }
  0x90   :  { %v255_v16 = vadd.f32 %v239_v11, %v238_v7  ;;  %v154_v51 = vadd.f32 %v138_v35, %v92_v1  ;;  %v155_v53 = vadd.f32 %v139_v32, %v93_v2  ;;  %v215_v1 = vadd.f32 %v199_v37, %v153_v39 }
  0x91   :  { %v230_v2 = vmax.f32 %v214_v44, 0.0  ;;  %v156_v31 = vadd.f32 %v140_v61, %v94_v34  ;;  %v157_v33 = vadd.f32 %v141_v0, %v95_v36  ;;  %v54_v34 = vmul.f32 %v454_v15, %v456_v17 }
  0x92   :  { %256 = vadd.xlane.f32.xlu1 %v255_v16  ;;  %v55_v36 = vmul.f32 %v454_v15, %v458_v18 }
  0x93   :  { %v246_v44 = vmin.f32 %v230_v2, 6.0 }
  0x94   :  { %v87_v17 = vadd.f32 %v452_v14, %v55_v36 }
  0x96   :  { %v174_v40 = vpop.permute.xlu1 %173  ;;  %v182_v9 = vpop.permute.xlu0 %181 }
  0x97   :  { %v188_v45 = vmul.f32 %v174_v40, %v472_v25  ;;  %v189_v46 = vmul.f32 %v174_v40, %v474_v26  ;;  %v196_v47 = vmul.f32 %v174_v40, %v501_v52  ;;  %v197_v48 = vmul.f32 %v174_v40, %v505_v58 }
  0x98   :  { %v200_v49 = vmul.f32 %v182_v9, %v501_v52  ;;  %v201_v27 = vmul.f32 %v182_v9, %v505_v58  ;;  %v192_v39 = vmul.f32 %v182_v9, %v472_v25  ;;  %v193_v40 = vmul.f32 %v182_v9, %v474_v26 }
  0x99   :  { %v212_v54 = vadd.f32 %v196_v47, %v150_v38  ;;  %v213_v55 = vadd.f32 %v197_v48, %v151_v41  ;;  %v204_v56 = vadd.f32 %v188_v45, %v142_v8  ;;  %v205_v57 = vadd.f32 %v189_v46, %v143_v43 }
  0x9a   :  { %v216_v3 = vadd.f32 %v200_v49, %v154_v51  ;;  %v217_v4 = vadd.f32 %v201_v27, %v155_v53  ;;  %v231_v38 = vmax.f32 %v215_v1, 0.0  ;;  %v132_v49 = vmul.f32 %v509_v60, %v468_v23  ;;  %v358_v1 = vld [vmem:[%s606_s1 + $0x60] sm:$0xff] }
  0x9b   :  { %v228_v5 = vmax.f32 %v212_v54, 0.0  ;;  %v229_v6 = vmax.f32 %v213_v55, 0.0  ;;  %v220_v7 = vmax.f32 %v204_v56, 0.0  ;;  %v221_v11 = vmax.f32 %v205_v57, 0.0  ;;  %376 = vmatpush.msra.mxu1 %v358_v1 }
  0x9c   :  { %v232_v13 = vmax.f32 %v216_v3, 0.0  ;;  %v233_v12 = vmax.f32 %v217_v4, 0.0  ;;  %v247_v45 = vmin.f32 %v231_v38, 6.0 }
  0x9d   :  { %v244_v19 = vmin.f32 %v228_v5, 6.0  ;;  %v245_v20 = vmin.f32 %v229_v6, 6.0  ;;  %v236_v10 = vmin.f32 %v220_v7, 6.0  ;;  %v237_v21 = vmin.f32 %v221_v11, 6.0  ;;  %v293_v6 = vld [vmem:[%s606_s1 + $0x30] sm:$0xff]  ;;  %v292_v11 = vld [vmem:[%s606_s1 + $0x28] sm:$0xff] }
  0x9e   :  { %v186_v16 = vpop.permute.xlu1 %185  ;;  %v248_v22 = vmin.f32 %v232_v13, 6.0  ;;  %v249_v28 = vmin.f32 %v233_v12, 6.0  ;;  %v267_v51 = vadd.f32 %v247_v45, %v246_v44  ;;  %v291_v13 = vld [vmem:[%s606_s1 + $0x20] sm:$0xff] }
  0x9f   :  { %v202_v29 = vmul.f32 %v186_v16, %v501_v52  ;;  %v203_v30 = vmul.f32 %v186_v16, %v505_v58  ;;  %v264_v35 = vadd.f32 %v245_v20, %v244_v19  ;;  %v252_v37 = vadd.f32 %v237_v21, %v236_v10 }
  0xa0   :  { %v270_v32 = vadd.f32 %v249_v28, %v248_v22  ;;  %v146_v52 = vadd.f32 %v130_v42, %v511_v62  ;;  %v147_v58 = vadd.f32 %v131_v50, %v513_v63  ;;  %v133_v62 = vmul.f32 %v509_v60, %v470_v24 }
  0xa1   :  { %v218_v41 = vadd.f32 %v202_v29, %v156_v31  ;;  %v219_v8 = vadd.f32 %v203_v30, %v157_v33  ;;  %265 = vadd.xlane.f32.xlu0 %v264_v35  ;;  %253 = vadd.xlane.f32.xlu2 %v252_v37  ;;  %v86_v63 = vadd.f32 %v452_v14, %v54_v34  ;;  %v305_v21 = vlaneseq }
  0xa2   :  { %271 = vadd.xlane.f32.xlu1 %v270_v32  ;;  %v208_v47 = vadd.f32 %v192_v39, %v146_v52  ;;  %v209_v48 = vadd.f32 %v193_v40, %v147_v58  ;;  %v194_v15 = vmul.f32 %v186_v16, %v472_v25  ;;  %v195_v18 = vmul.f32 %v186_v16, %v474_v26  ;;  %v294_v25 = vld [vmem:[%s606_s1 + $0x38] sm:$0xff] }
  0xa3   :  { %v234_v59 = vmax.f32 %v218_v41, 0.0  ;;  %v235_v43 = vmax.f32 %v219_v8, 0.0  ;;  %v148_v55 = vadd.f32 %v132_v49, %v86_v63  ;;  %v149_v56 = vadd.f32 %v133_v62, %v87_v17  ;;  %344 = vmatpush.msra.mxu0 %v294_v25 }
  0xa4   :  { %v224_v53 = vmax.f32 %v208_v47, 0.0  ;;  %v225_v54 = vmax.f32 %v209_v48, 0.0  ;;  %v417_v26 = vmov 256.0   ;;  %v306_v22 = vand.u32 127, %v305_v21 }
  0xa5   :  { %v250_v9 = vmin.f32 %v234_v59, 6.0  ;;  %v251_v46 = vmin.f32 %v235_v43, 6.0  ;;  %v210_v61 = vadd.f32 %v194_v15, %v148_v55  ;;  %v211_v24 = vadd.f32 %v195_v18, %v149_v56  ;;  %345 = vmatpush.msra.mxu0 %v293_v6  ;;  %v357_v15 = vld [vmem:[%s606_s1 + $0x58] sm:$0xff]  ;;  %v356_v18 = vld [vmem:[%s606_s1 + $0x50] sm:$0xff] }
  0xa6   :  { %v240_v23 = vmin.f32 %v224_v53, 6.0  ;;  %v241_v57 = vmin.f32 %v225_v54, 6.0  ;;  %411 = vrcp.f32 %v417_v26  ;;  %v308_v31 = vadd.s32 4294967288, %v306_v22  ;;  %377 = vmatpush.msra.mxu1 %v357_v15  ;;  %v355_v53 = vld [vmem:[%s606_s1 + $0x48] sm:$0xff]  ;;  %v409_v54 = vld [vmem:[%s606_s1 + $0x40] ss:$0 sm:$0xff] }
  0xa7   :  { %v273_v27 = vadd.f32 %v251_v46, %v250_v9  ;;  %v226_v0 = vmax.f32 %v210_v61, 0.0  ;;  %v227_v3 = vmax.f32 %v211_v24, 0.0  ;;  %346 = vmatpush.msra.mxu0 %v292_v11  ;;  %v312_v38 = vadd.s32 4294967280, %v306_v22  ;;  %v410_v61 = vld [vmem:[%s606_s1 + $0x68] ss:$0 sm:$0xff] }
  0xa8   :  { %v258_v60 = vadd.f32 %v241_v57, %v240_v23  ;;  %v316_v43 = vadd.s32 4294967272, %v306_v22  ;;  %378 = vmatpush.msra.mxu1 %v356_v18 }
  0xa9   :  { %274 = vadd.xlane.f32.xlu0 %v273_v27  ;;  %268 = vadd.xlane.f32.xlu2 %v267_v51  ;;  %v242_v14 = vmin.f32 %v226_v0, 6.0  ;;  %v243_v4 = vmin.f32 %v227_v3, 6.0 }
  0xaa   :  { %347 = vmatpush.msra.mxu0 %v291_v13  ;;  %379 = vmatpush.msra.mxu1 %v355_v53 }
  0xab   :  { %v261_v5 = vadd.f32 %v243_v4, %v242_v14 }
  0xac   :  { %v412_v7 = vpop.eup %411 }
  0xad   :  { %v277_v12 = vmul.f32 256.0, %v412_v7  ;;  %vm281_vm0 = vweird.f32 %v412_v7 }
  0xaf   :  { %v278_v19 = vsub.f32 1.0, %v277_v12 }
  0xb1   :  { %259 = vadd.xlane.f32.xlu2 %v258_v60  ;;  %v279_v20 = vmul.f32 %v412_v7, %v278_v19 }
  0xb3   :  { %v280_v50 = vadd.f32 %v412_v7, %v279_v20 }
  0xb5   :  { %v282_v28 = vsel %vm281_vm0, %v412_v7, %v280_v50 }
  0xb9   :  { %262 = vadd.xlane.f32.xlu2 %v261_v5 }
 0x105   :  { %v257_v42 = vpop.xlane.xlu1 %256 }
 0x106   :  { %v284_v8 = vmul.f32 %v282_v28, %v257_v42 }
 0x108   :  { %v309_v9 = vperm.slane %v284_v8, %v308_v31 }
 0x114   :  { %v254_v2 = vpop.xlane.xlu2 %253  ;;  %v266_v16 = vpop.xlane.xlu0 %265 }
 0x115   :  { %v287_v33 = vmul.f32 %v282_v28, %v266_v16  ;;  %v272_v35 = vpop.xlane.xlu1 %271  ;;  %v283_v32 = vmul.f32 %v282_v28, %v254_v2 }
 0x116   :  { %v289_v39 = vmul.f32 %v282_v28, %v272_v35 }
 0x117   :  { %v320_v59 = vperm.slane %v287_v33, %v306_v22  ;;  %v307_v52 = vperm.slane %v283_v32, %v306_v22 }
 0x118   :  { %v323_v36 = vperm.slane %v289_v39, %v312_v38 }
 0x119   :  { %v311_v48 = vsel %vm310_vm1, %v309_v9, %v307_v52 }
 0x11c   :  { %v269_v10 = vpop.xlane.xlu2 %268  ;;  %v275_v40 = vpop.xlane.xlu0 %274 }
 0x11d   :  { %v288_v29 = vmul.f32 %v282_v28, %v269_v10  ;;  %v290_v58 = vmul.f32 %v282_v28, %v275_v40 }
 0x11f   :  { %v321_v37 = vperm.slane %v288_v29, %v308_v31  ;;  %v325_v49 = vperm.slane %v290_v58, %v316_v43 }
 0x121   :  { %v322_v34 = vsel %vm310_vm1, %v321_v37, %v320_v59 }
 0x122   :  { %v324_v47 = vsel %vm314_vm2, %v323_v36, %v322_v34 }
 0x123   :  { %v326_v17 = vsel %vm318_vm3, %v325_v49, %v324_v47 }
 0x124   :  { %v260_v30 = vpop.xlane.xlu2 %259 }
 0x125   :  { %v285_v41 = vmul.f32 %v282_v28, %v260_v30 }
 0x127   :  { %v313_v44 = vperm.slane %v285_v41, %v312_v38 }
 0x129   :  { %v315_v27 = vsel %vm314_vm2, %v313_v44, %v311_v48 }
 0x12c   :  { %v263_v45 = vpop.xlane.xlu2 %262 }
 0x12d   :  { %v286_v46 = vmul.f32 %v282_v28, %v263_v45 }
 0x12f   :  { %v317_v62 = vperm.slane %v286_v46, %v316_v43 }
 0x131   :  { %v319_v63 = vsel %vm318_vm3, %v317_v62, %v315_v27 }
 0x132   :  { %v328_v51 = vsel %vm327_vm4, %v326_v17, %v319_v63 }
 0x133   :  { %394 = vmatmul.msk.f32.vlgmr.msra.gmra.mxu0 %vm329_vm5, %v328_v51 }
 0x1b0   :  { %v349_v55 = vpop.f32.mrf.mxu0 }
 0x1b1   :  { %v350_v56 = vadd.f32 %v409_v54, %v349_v55 }
 0x1b3   :  { %v353_v23 = vmul.f32 0.01, %v350_v56  ;;  %vm352_vm6 = vcmp.ge.f32.partialorder %v350_v56, 0.0 }
 0x1b5   :  { %v354_v57 = vsel %vm352_vm6, %v350_v56, %v353_v23 }
 0x1b6   :  { %395 = vmatmul.msk.f32.vlgmr.msra.gmra.mxu1 %vm329_vm5, %v354_v57 }
 0x233   :  { %v381_v24 = vpop.f32.mrf.mxu1 }
 0x234   :  { %v382_v60 = vadd.f32 %v410_v61, %v381_v24 }
 0x236   :  { %384 = vst [vmem:[%s608_s2] sm:$0x3] %v382_v60 }

</bundles_post_ra>
